<compile_context>
chip_gen: v5e
topology: v5e:2x2
jax: 0.10.0
libtpu: 0.0.40
codegen_flags: <defaults>
</compile_context>

<pallas_src>
import functools

import jax
import jax.numpy as jnp
from jax.experimental import pallas as pl
from jax.experimental.pallas import tpu as pltpu

LANE = 128        # all feature dims are zero-padded to this lane width
_BIAS_ROWS = 16   # bias block rows in the slab (multiple of 16 keeps bf16 tiles aligned)


def _round_up(n, m):
    return (n + m - 1) // m * m


def _fused_mlp_kernel(x_ref, slab_ref, o_ref, *, num_layers, batch_rows):
    """Fully fused MLP.

    x_ref    : (batch_rows, 128) bf16, zero-padded input
    slab_ref : (num_layers * (128 + 16), 128) bf16; per layer:
                 rows [0,128)    -> zero-padded (in,out) weight (== W_pt.T)
                 rows [128,144)  -> bias pre-broadcast over rows, zero-padded lanes
    o_ref    : (batch_rows, 128) f32, lane-dense (unmasked) output store
    """
    stride = LANE + _BIAS_ROWS
    h = x_ref[...]                                                  # bf16 (B,128)
    for i in range(num_layers):
        off = i * stride
        w = slab_ref[off:off + LANE, :]                             # (128,128) bf16 view
        b = slab_ref[off + LANE:off + LANE + batch_rows, :]         # (B,128) bf16 view
        acc = jnp.dot(h, w, preferred_element_type=jnp.float32)     # MXU, f32 accumulate
        acc = acc + b.astype(jnp.float32)                           # full-vreg VPU add
        if i < num_layers - 1:
            acc = jnp.maximum(acc, 0.0)
            h = acc.astype(jnp.bfloat16)                            # bf16 for next MXU pass
        else:
            h = acc
    o_ref[...] = h.astype(o_ref.dtype)


def init_mlp_params(key, layers):
    """Init matching nn.Linear's uniform(-1/sqrt(in), 1/sqrt(in)).

    Weights are stored in the MXU-friendly (in, out) layout, i.e. W_stored ==
    W_pytorch.T, so y = x @ W_stored + b == x @ W_pytorch.T + b.
    """
    params = []
    dims = list(zip(layers[:-1], layers[1:]))
    keys = jax.random.split(key, len(dims))
    for k, (in_dim, out_dim) in zip(keys, dims):
        kw, kb = jax.random.split(k)
        bound = 1.0 / jnp.sqrt(in_dim)
        w = jax.random.uniform(kw, (in_dim, out_dim), jnp.float32, -bound, bound)
        b = jax.random.uniform(kb, (out_dim,), jnp.float32, -bound, bound)
        params.append((w, b))
    return params


def pack_params_slab(params, dtype=jnp.bfloat16):
    """Pack [(w, b), ...] into ONE aligned bf16 slab (done once, outside the kernel).

    Per layer: a (128,128) zero-padded weight block followed by a (16,128)
    pre-broadcast, zero-padded bias block.  Layer stride = 144 rows (multiple
    of 16), so every per-layer view is bf16-tile aligned.
    """
    blocks = []
    for w, b in params:
        in_dim, out_dim = w.shape
        if in_dim > LANE or out_dim > LANE:
            raise ValueError("packer assumes all feature dims <= 128")
        w_pad = jnp.zeros((LANE, LANE), dtype).at[:in_dim, :out_dim].set(w.astype(dtype))
        b_pad = jnp.zeros((_BIAS_ROWS, LANE), dtype).at[:, :out_dim].set(
            jnp.broadcast_to(b.astype(dtype), (_BIAS_ROWS, out_dim)))
        blocks.append(w_pad)
        blocks.append(b_pad)
    return jnp.concatenate(blocks, axis=0)


@functools.partial(jax.jit, static_argnames=("layers",))
def mlp_forward(slab, x, *, layers):
    """Matches MLPModel.forward: Linear+ReLU for hidden layers, plain Linear last."""
    num_layers = len(layers) - 1
    batch = x.shape[0]
    batch_rows = _round_up(batch, 8)
    if batch_rows > _BIAS_ROWS:
        raise ValueError("demo packer bakes biases for batch <= 16")
    out_dim = layers[-1]

    # Zero-pad the input once to a lane-dense (batch_rows, 128) bf16 tile.
    x_pad = jnp.zeros((batch_rows, LANE), jnp.bfloat16)
    x_pad = x_pad.at[:batch, :layers[0]].set(x.astype(jnp.bfloat16))

    kernel = functools.partial(
        _fused_mlp_kernel, num_layers=num_layers, batch_rows=batch_rows)
    vmem = pl.BlockSpec(memory_space=pltpu.MemorySpace.VMEM)
    cost = pl.CostEstimate(
        flops=2 * batch_rows * LANE * LANE * num_layers,
        transcendentals=0,
        bytes_accessed=(x_pad.size * x_pad.dtype.itemsize
                        + slab.size * slab.dtype.itemsize
                        + batch_rows * LANE * 4))

    # TODO(synk): if this MLP scales up (large batch / wide layers), add a
    # leading "parallel" batch grid axis (v7x has 2 TensorCores) and re-derive
    # the all-resident-in-VMEM assumption against v7x's 64 MiB VMEM (vs 128 MiB
    # on v5e/v6e), raising vmem_limit_bytes before introducing K/N tiling.
    out = pl.pallas_call(
        kernel,
        out_shape=jax.ShapeDtypeStruct((batch_rows, LANE), jnp.float32),
        in_specs=[vmem, vmem],
        out_specs=vmem,
        cost_estimate=cost,
    )(x_pad, slab)
    return out[:batch, :out_dim]


def mlp_reference(params, x, *, quantize):
    """Pure-JAX reference. quantize=True mirrors the kernel's bf16 numerics."""
    n = len(params)
    cast = (lambda a: a.astype(jnp.bfloat16).astype(jnp.float32)) if quantize \
        else (lambda a: a)
    h = cast(x)
    for i, (w, b) in enumerate(params):
        h = jnp.dot(h, cast(w), preferred_element_type=jnp.float32) + cast(b)
        if i < n - 1:
            h = jnp.maximum(h, 0.0)
            if quantize:
                h = cast(h)
    return h


if __name__ == "__main__":
    # MLPModel(layers=[32, 64, 64, 16]) on a batch of 8 inputs.
    layers = (32, 64, 64, 16)
    batch = 8

    key = jax.random.PRNGKey(0)
    k_x, k_p = jax.random.split(key)
    x = jax.random.normal(k_x, (batch, layers[0]), jnp.float32)
    params = init_mlp_params(k_p, list(layers))
    slab = pack_params_slab(params)

    out = jax.block_until_ready(mlp_forward(slab, x, layers=layers))

    ref_bf16 = mlp_reference(params, x, quantize=True)   # same numerics as kernel
    ref_f32 = mlp_reference(params, x, quantize=False)   # full-f32 sanity reference

    assert out.shape == (batch, layers[-1])
    assert jnp.allclose(out, ref_bf16, atol=1e-3, rtol=1e-3)
    # Informational only: bf16-weight quantization error vs full-f32 math.
    _max_q_err = float(jnp.max(jnp.abs(out - ref_f32)))
    print("KERNEL_OK")
</pallas_src>

<mosaic_0001>
module attributes {stable_mosaic.version = 11 : i64} {
  func.func @_fused_mlp_kernel(%arg0: memref<8x128xbf16, #tpu.memory_space<vmem>>, %arg1: memref<432x128xbf16, #tpu.memory_space<vmem>>, %arg2: memref<8x128xf32, #tpu.memory_space<vmem>>) attributes {dimension_semantics = [], scalar_prefetch = 0 : i64, scratch_operands = 0 : i64, tpu.core_type = #tpu.core_type<tc>} {
    %c0 = arith.constant 0 : index
    %c0_0 = arith.constant 0 : index
    %0 = vector.load %arg0[%c0, %c0_0] : memref<8x128xbf16, #tpu.memory_space<vmem>>, vector<8x128xbf16>
    %c0_1 = arith.constant 0 : index
    %c0_2 = arith.constant 0 : index
    %1 = vector.load %arg1[%c0_1, %c0_2] : memref<432x128xbf16, #tpu.memory_space<vmem>>, vector<128x128xbf16>
    %c128 = arith.constant 128 : index
    %c0_3 = arith.constant 0 : index
    %2 = vector.load %arg1[%c128, %c0_3] : memref<432x128xbf16, #tpu.memory_space<vmem>>, vector<8x128xbf16>
    %cst = arith.constant dense<0.000000e+00> : vector<8x128xf32>
    %3 = tpu.matmul %0, %1, %cst {dimension_numbers = #tpu.dot_dimension_numbers<[1], [0], [0], [1], [0, 0, 1, 1], [], []>} : vector<8x128xbf16>, vector<128x128xbf16>, vector<8x128xf32> -> vector<8x128xf32>
    %4 = arith.extf %2 : vector<8x128xbf16> to vector<8x128xf32>
    %5 = arith.addf %3, %4 : vector<8x128xf32>
    %cst_4 = arith.constant 0.000000e+00 : f32
    %6 = vector.broadcast %cst_4 : f32 to vector<8x128xf32>
    %7 = arith.maximumf %5, %6 : vector<8x128xf32>
    %8 = arith.truncf %7 : vector<8x128xf32> to vector<8x128xbf16>
    %c144 = arith.constant 144 : index
    %c0_5 = arith.constant 0 : index
    %9 = vector.load %arg1[%c144, %c0_5] : memref<432x128xbf16, #tpu.memory_space<vmem>>, vector<128x128xbf16>
    %c272 = arith.constant 272 : index
    %c0_6 = arith.constant 0 : index
    %10 = vector.load %arg1[%c272, %c0_6] : memref<432x128xbf16, #tpu.memory_space<vmem>>, vector<8x128xbf16>
    %cst_7 = arith.constant dense<0.000000e+00> : vector<8x128xf32>
    %11 = tpu.matmul %8, %9, %cst_7 {dimension_numbers = #tpu.dot_dimension_numbers<[1], [0], [0], [1], [0, 0, 1, 1], [], []>} : vector<8x128xbf16>, vector<128x128xbf16>, vector<8x128xf32> -> vector<8x128xf32>
    %12 = arith.extf %10 : vector<8x128xbf16> to vector<8x128xf32>
    %13 = arith.addf %11, %12 : vector<8x128xf32>
    %cst_8 = arith.constant 0.000000e+00 : f32
    %14 = vector.broadcast %cst_8 : f32 to vector<8x128xf32>
    %15 = arith.maximumf %13, %14 : vector<8x128xf32>
    %16 = arith.truncf %15 : vector<8x128xf32> to vector<8x128xbf16>
    %c288 = arith.constant 288 : index
    %c0_9 = arith.constant 0 : index
    %17 = vector.load %arg1[%c288, %c0_9] : memref<432x128xbf16, #tpu.memory_space<vmem>>, vector<128x128xbf16>
    %c416 = arith.constant 416 : index
    %c0_10 = arith.constant 0 : index
    %18 = vector.load %arg1[%c416, %c0_10] : memref<432x128xbf16, #tpu.memory_space<vmem>>, vector<8x128xbf16>
    %cst_11 = arith.constant dense<0.000000e+00> : vector<8x128xf32>
    %19 = tpu.matmul %16, %17, %cst_11 {dimension_numbers = #tpu.dot_dimension_numbers<[1], [0], [0], [1], [0, 0, 1, 1], [], []>} : vector<8x128xbf16>, vector<128x128xbf16>, vector<8x128xf32> -> vector<8x128xf32>
    %20 = arith.extf %18 : vector<8x128xbf16> to vector<8x128xf32>
    %21 = arith.addf %19, %20 : vector<8x128xf32>
    %c0_12 = arith.constant 0 : index
    %c0_13 = arith.constant 0 : index
    %22 = vector.load %arg2[%c0_12, %c0_13] : memref<8x128xf32, #tpu.memory_space<vmem>>, vector<8x128xf32>
    tpu.vector_store %arg2[%c0_12, %c0_13], %21 {strides = array<i32>} : memref<8x128xf32, #tpu.memory_space<vmem>>, vector<8x128xf32>,
    return
  }
}

</mosaic_0001>

<bundles_post_ra>
// kernel: mlp_forward.1
= control target key start
LH: loop header
LB: loop body
LE: loop exit
PB: predicated region body
PF: predicated region fallthrough
CT: control target
= control target key end

     0   :  { %7 = vsyncpa [#allocation3], 0  ;;  %s492_s0 = inlined_call_operand.vmem [shape: bf16[8,128], index: 0, kind: input, shape index: {}]   ;;  %s493_s1 = inlined_call_operand.hbm [shape: bf16[432,128], index: 1, kind: input, shape index: {}]   ;;  %s494_s2 = inlined_call_operand.hbm [shape: f32[8,128], index: 2, kind: output, shape index: {}]  }
   0x1   :  { %8 = vsyncpa [#allocation4], 0  ;;  %s15_s11 = sshll.u32 %s493_s1, 4  ;;  %s464_s12 = smov [#allocation2]   ;;  %s16_s11 = int_to_ptr.hbm [resolvable:$true] %s15_s11 }
   0x2   :  { %s17_s13 = sshll.u32 %s464_s12, 4  ;;  %s465_s14 = smov 64   ;;  %s18_s13 = int_to_ptr.vmem [resolvable:$true] %s17_s13 }
   0x3   :  { %s466_s15 = smov 4  }
   0x4   :  { %23 = dma.hbm_to_vmem [thread:$0]  %s16_s11, 3456, %s18_s13, [#allocation3], %s465_s14, %s465_s14, %s466_s15  }
   0x5   :  { %460 = dma.done.wait [#allocation3], 3456  }
   0x6   :  { %461 = vsyncadd [#allocation3], 4294963840  ;;  %v391_v0 = vld [vmem:[#allocation2 + $0x38] sm:$0xff]  ;;  %v390_v1 = vld [vmem:[#allocation2 + $0x30] sm:$0xff]  ;;  %s278_s20 = sshll.u32 %s494_s2, 4  ;;  %s279_s20 = int_to_ptr.hbm [resolvable:$true] %s278_s20 }
   0x7   :  { %95 = vmatpush.bf16.msra.mxu0 %v391_v0  ;;  %v399_v2 = vld [vmem:[#allocation2 + $0x80] sm:$0xff]  ;;  %v398_v3 = vld [vmem:[#allocation2 + $0x78] sm:$0xff]  ;;  %v389_v4 = vld [vmem:[#allocation2 + $0x28] sm:$0xff] }
   0x8   :  { %176 = vmatpush.bf16.msra.mxu1 %v399_v2  ;;  %v397_v5 = vld [vmem:[#allocation2 + $0x70] sm:$0xff]  ;;  %v388_v6 = vld [vmem:[#allocation2 + $0x20] sm:$0xff]  ;;  %v396_v7 = vld [vmem:[#allocation2 + $0x68] sm:$0xff] }
   0x9   :  { %v387_v8 = vld [vmem:[#allocation2 + $0x18] sm:$0xff]  ;;  %v395_v9 = vld [vmem:[#allocation2 + $0x60] sm:$0xff]  ;;  %v386_v10 = vld [vmem:[#allocation2 + $0x10] sm:$0xff] }
   0xa   :  { %v394_v11 = vld [vmem:[#allocation2 + $0x58] sm:$0xff]  ;;  %v385_v12 = vld [vmem:[#allocation2 + $0x8] sm:$0xff]  ;;  %v384_v13 = vld [vmem:[#allocation2] sm:$0xff] }
   0xb   :  { %96 = vmatpush.bf16.msra.mxu0 %v390_v1  ;;  %v28_v14 = vld [vmem:[%s492_s0] sm:$0xf]  ;;  %v393_v15 = vld [vmem:[#allocation2 + $0x50] sm:$0xff]  ;;  %v392_v16 = vld [vmem:[#allocation2 + $0x48] sm:$0xff]  ;;  %s467_s0 = smov [#allocation5]  }
   0xc   :  { %177 = vmatpush.bf16.msra.mxu1 %v398_v3  ;;  %v407_v17 = vld [vmem:[#allocation2 + $0xc8] sm:$0xff]  ;;  %v406_v18 = vld [vmem:[#allocation2 + $0xc0] sm:$0xff]  ;;  %v405_v19 = vld [vmem:[#allocation2 + $0xb8] sm:$0xff]  ;;  %s276_s17 = sshll.u32 %s467_s0, 4  ;;  %s277_s17 = int_to_ptr.vmem [resolvable:$true] %s276_s17 }
   0xd   :  { %257 = vmatpush.bf16.msra.mxu2 %v407_v17  ;;  %v404_v20 = vld [vmem:[#allocation2 + $0xb0] sm:$0xff]  ;;  %v403_v21 = vld [vmem:[#allocation2 + $0xa8] sm:$0xff]  ;;  %v45_v22 = vld [vmem:[#allocation2 + $0x40] sm:$0xf] }
   0xe   :  { %v402_v23 = vld [vmem:[#allocation2 + $0xa0] sm:$0xff]  ;;  %v46_v24 = vunpack.c.l.bf16 %v45_v22  ;;  %v401_v30 = vld [vmem:[#allocation2 + $0x98] sm:$0xff]  ;;  %v400_v31 = vld [vmem:[#allocation2 + $0x90] sm:$0xff] }
   0xf   :  { %97 = vmatpush.bf16.msra.mxu0 %v389_v4  ;;  %v126_v32 = vld [vmem:[#allocation2 + $0x88] sm:$0xf]  ;;  %v207_v39 = vld [vmem:[#allocation2 + $0xd0] sm:$0xf] }
  0x10   :  { %178 = vmatpush.bf16.msra.mxu1 %v397_v5  ;;  %v127_v33 = vunpack.c.l.bf16 %v126_v32  ;;  %v208_v40 = vunpack.c.l.bf16 %v207_v39 }
  0x11   :  { %258 = vmatpush.bf16.msra.mxu2 %v406_v18 }
  0x13   :  { %98 = vmatpush.bf16.msra.mxu0 %v388_v6 }
  0x14   :  { %179 = vmatpush.bf16.msra.mxu1 %v396_v7 }
  0x15   :  { %259 = vmatpush.bf16.msra.mxu2 %v405_v19 }
  0x17   :  { %99 = vmatpush.bf16.msra.mxu0 %v387_v8 }
  0x18   :  { %180 = vmatpush.bf16.msra.mxu1 %v395_v9 }
  0x19   :  { %260 = vmatpush.bf16.msra.mxu2 %v404_v20 }
  0x1b   :  { %100 = vmatpush.bf16.msra.mxu0 %v386_v10 }
  0x1c   :  { %181 = vmatpush.bf16.msra.mxu1 %v394_v11 }
  0x1d   :  { %261 = vmatpush.bf16.msra.mxu2 %v403_v21 }
  0x1f   :  { %101 = vmatpush.bf16.msra.mxu0 %v385_v12 }
  0x20   :  { %182 = vmatpush.bf16.msra.mxu1 %v393_v15 }
  0x21   :  { %262 = vmatpush.bf16.msra.mxu2 %v402_v23 }
  0x23   :  { %102 = vmatpush.bf16.msra.mxu0 %v384_v13 }
  0x24   :  { %183 = vmatpush.bf16.msra.mxu1 %v392_v16 }
  0x25   :  { %263 = vmatpush.bf16.msra.mxu2 %v401_v30 }
  0x26   :  { %103 = vmatmul.bf16.vlgmr.msra.gmra.mxu0 %v28_v14 }
  0x29   :  { %264 = vmatpush.bf16.msra.mxu2 %v400_v31 }
  0xa3   :  { %v104_v25 = vpop.f32.mrf.mxu0 }
  0xa4   :  { %v105_v26 = vadd.f32 %v104_v25, %v46_v24 }
  0xa6   :  { %v108_v27 = vmax.f32 %v105_v26, 0.0 }
  0xa8   :  { %v109_v28 = vpack.c.bf16 %v108_v27, %v108_v27 }
  0xaa   :  { %184 = vmatmul.bf16.vlgmr.msra.gmra.mxu1 %v109_v28 }
  0xab   :  { %v106_v29 = vpop.f32.mrf.mxu0 }
 0x127   :  { %v185_v34 = vpop.f32.mrf.mxu1 }
 0x128   :  { %v186_v35 = vadd.f32 %v185_v34, %v127_v33 }
 0x12a   :  { %v189_v36 = vmax.f32 %v186_v35, 0.0 }
 0x12c   :  { %v190_v37 = vpack.c.bf16 %v189_v36, %v189_v36 }
 0x12e   :  { %265 = vmatmul.bf16.vlgmr.msra.gmra.mxu2 %v190_v37 }
 0x12f   :  { %v187_v38 = vpop.f32.mrf.mxu1 }
 0x1b1   :  { %v266_v41 = vpop.f32.mrf.mxu2 }
 0x1b2   :  { %v267_v42 = vadd.f32 %v266_v41, %v208_v40 }
 0x1b4   :  { %270 = vst [vmem:[#allocation5] sm:$0xff] %v267_v42 }
 0x1b5   :  { %281 = dma.vmem_to_hbm [thread:$0]  %s277_s17, 128, %s279_s20, [#allocation4]  }
 0x1b9   :  { %v268_v43 = vpop.f32.mrf.mxu2 }
 0x1ba   :  { %462 = dma.done.wait [#allocation4], 128  }
 0x1bb   :  { %463 = vsyncadd [#allocation4], 4294967168 }
 0x1bc   :  { %286 = vsyncpa [#allocation3], 1 }
 0x1bd   :  { %287 = vsyncpa [#allocation4], 1 }

</bundles_post_ra>
